<compile_context>
chip_gen: v6e
topology: v6e:2x2x1
jax: 0.10.0
libtpu: 0.0.40
codegen_flags: <defaults>
</compile_context>

<pallas_src>
import functools

import jax
import jax.numpy as jnp
from jax.experimental import pallas as pl
from jax.experimental.pallas import tpu as pltpu

_LANE = 128


def _round_up(x, m):
    return (x + m - 1) // m * m


def _cdiv(a, b):
    return -(-a // b)


def _tpu_vmem_capacity_bytes():
    try:
        return int(pltpu.get_tpu_info().vmem_capacity_bytes)
    except Exception:
        return 64 * 1024 * 1024  # smallest per-TC VMEM across v5e/v6e/v7x


def _default_vmem_budget_bytes():
    # ~75% of physical VMEM: ~96 MiB on v5e/v6e (128 MiB), ~48 MiB on v7x.
    return (_tpu_vmem_capacity_bytes() * 3) // 4


def _plan_tiles(B, latent_p, hidden_p, out_p, compute_itemsize, out_itemsize,
                block_b, block_k, budget_bytes):
    """Pick (tb, tk, B_p) so the double-buffered working set fits the budget."""
    granule = {4: 8, 2: 16, 1: 32}.get(compute_itemsize, 8)

    def working_set(tb, tk):
        return (2 * tb * latent_p * compute_itemsize          # z tile (2x buffered)
                + 2 * latent_p * tk * compute_itemsize        # w1 block (2x)
                + 2 * tk * out_p * compute_itemsize           # w2 block (2x)
                + 2 * 8 * tk * 4 + 2 * 8 * out_p * 4          # biases (f32, sublane pad)
                + 2 * tb * out_p * out_itemsize               # out tile (2x buffered)
                + tb * out_p * 4                              # f32 accumulator scratch
                + tb * tk * 4)                                # f32 intermediate h slice

    # hidden tile: largest multiple-of-128 *divisor* of hidden_p that respects
    # block_k and (paired with the smallest batch tile) the VMEM budget.
    n128 = hidden_p // _LANE
    divisors = [d * _LANE for d in range(1, n128 + 1) if n128 % d == 0]
    tk = max(d for d in divisors if d <= max(block_k, _LANE))
    while tk > divisors[0] and working_set(granule, tk) > budget_bytes:
        tk = max(d for d in divisors if d < tk)

    # batch tile: as large as the budget allows (sublane-granule aligned), then
    # re-derived from the tile count so batch padding is < granule rows/tile.
    tb = max(granule, min(_round_up(block_b, granule), _round_up(B, granule)))
    while tb > granule and working_set(tb, tk) > budget_bytes:
        tb = max(granule, _round_up(tb // 2, granule))
    n_b = _cdiv(B, tb)
    tb = max(granule, _round_up(_cdiv(B, n_b), granule))
    B_p = n_b * tb
    return tb, tk, B_p, working_set(tb, tk)


def _fcnn_decoder_kernel(z_ref, w1_ref, b1_ref, w2_ref, b2_ref, out_ref,
                         acc_ref):
    k = pl.program_id(1)

    @pl.when(k == 0)
    def _init():
        acc_ref[...] = jnp.zeros_like(acc_ref)

    # fc1 hidden-slice + ReLU (MXU matmul, f32 accumulate, f32 tail).
    h = jnp.dot(z_ref[...], w1_ref[...], preferred_element_type=jnp.float32)
    h = jnp.maximum(h + b1_ref[...], 0.0)

    # Partial fc2: accumulate this hidden slice's contribution in f32.
    acc_ref[...] += jnp.dot(h.astype(w2_ref.dtype), w2_ref[...],
                            preferred_element_type=jnp.float32)

    @pl.when(k == pl.num_programs(1) - 1)
    def _finish():
        out_ref[...] = jax.nn.sigmoid(
            acc_ref[...] + b2_ref[...]).astype(out_ref.dtype)


def prepare_params(w1, b1, w2, b2, compute_dtype=jnp.bfloat16):
    """One-time padding/cast of the weights (hoisted out of the hot path).

    w1: (latent, hidden), b1: (hidden,), w2: (hidden, output), b2: (output,).
    Feature dims are zero-padded to multiples of 128 (lane-dense MXU feeds,
    unmasked vst); padded entries are zero so they never leak into the output.
    Biases stay f32 (the elementwise tail is always f32).
    """
    latent, hidden = w1.shape
    out_dim = w2.shape[1]
    latent_p = _round_up(latent, _LANE)
    hidden_p = _round_up(hidden, _LANE)
    out_p = _round_up(out_dim, _LANE)

    w1_p = jnp.zeros((latent_p, hidden_p), compute_dtype).at[:latent, :hidden].set(
        w1.astype(compute_dtype))
    b1_p = jnp.zeros((1, hidden_p), jnp.float32).at[:, :hidden].set(
        b1.astype(jnp.float32)[None, :])
    w2_p = jnp.zeros((hidden_p, out_p), compute_dtype).at[:hidden, :out_dim].set(
        w2.astype(compute_dtype))
    b2_p = jnp.zeros((1, out_p), jnp.float32).at[:, :out_dim].set(
        b2.astype(jnp.float32)[None, :])
    return w1_p, b1_p, w2_p, b2_p


def fcnn_decoder_padded(z, w1_p, b1_p, w2_p, b2_p, *, out_dim,
                        block_b=1024, block_k=512,
                        vmem_budget_bytes=None, out_dtype=None):
    """Hot path: z (B, latent) + pre-padded params -> (B, out_dim)."""
    B, latent = z.shape
    latent_p, hidden_p = w1_p.shape
    out_p = w2_p.shape[1]
    compute_dtype = w1_p.dtype
    out_dtype = z.dtype if out_dtype is None else out_dtype

    budget = (_default_vmem_budget_bytes() if vmem_budget_bytes is None
              else vmem_budget_bytes)
    tb, tk, B_p, work = _plan_tiles(
        B, latent_p, hidden_p, out_p,
        jnp.dtype(compute_dtype).itemsize, jnp.dtype(out_dtype).itemsize,
        block_b, block_k, budget)
    n_b, n_k = B_p // tb, hidden_p // tk

    # Per-call padding of the (small) activation only.
    z_p = jnp.zeros((B_p, latent_p), compute_dtype).at[:B, :latent].set(
        z.astype(compute_dtype))

    flops = 2 * B_p * (latent_p * hidden_p + hidden_p * out_p)
    bytes_accessed = (
        z_p.size * z_p.dtype.itemsize
        + n_b * (w1_p.size * w1_p.dtype.itemsize
                 + w2_p.size * w2_p.dtype.itemsize
                 + b1_p.size * 4 + b2_p.size * 4)
        + B_p * out_p * jnp.dtype(out_dtype).itemsize)

    vmem_limit = int(min(_tpu_vmem_capacity_bytes(),
                         max(32 * 1024 * 1024, int(work * 1.25) + (2 << 20))))

    out_padded = pl.pallas_call(
        _fcnn_decoder_kernel,
        out_shape=jax.ShapeDtypeStruct((B_p, out_p), out_dtype),
        grid_spec=pltpu.PrefetchScalarGridSpec(
            num_scalar_prefetch=0,
            grid=(n_b, n_k),
            in_specs=[
                pl.BlockSpec((tb, latent_p), lambda i, k: (i, 0)),   # z tile
                pl.BlockSpec((latent_p, tk), lambda i, k: (0, k)),   # w1 slice
                pl.BlockSpec((1, tk), lambda i, k: (0, k)),          # b1 slice
                pl.BlockSpec((tk, out_p), lambda i, k: (k, 0)),      # w2 slice
                pl.BlockSpec((1, out_p), lambda i, k: (0, 0)),       # b2 resident
            ],
            out_specs=pl.BlockSpec((tb, out_p), lambda i, k: (i, 0)),
            scratch_shapes=[pltpu.VMEM((tb, out_p), jnp.float32)],
        ),
        compiler_params=pltpu.CompilerParams(
            dimension_semantics=("parallel", "arbitrary"),
            vmem_limit_bytes=vmem_limit),
        cost_estimate=pl.CostEstimate(
            flops=flops,
            transcendentals=B_p * out_p,
            bytes_accessed=bytes_accessed),
    )(z_p, w1_p, b1_p, w2_p, b2_p)

    return out_padded[:B, :out_dim]


def fcnn_decoder(z, w1, b1, w2, b2, *, compute_dtype=None, **kwargs):
    """Convenience wrapper (pads weights per call; prefer prepare_params +
    fcnn_decoder_padded in a hot loop)."""
    if compute_dtype is None:
        compute_dtype = (jnp.bfloat16 if z.dtype == jnp.float32 else z.dtype)
    params = prepare_params(w1, b1, w2, b2, compute_dtype=compute_dtype)
    return fcnn_decoder_padded(z, *params, out_dim=w2.shape[1], **kwargs)


def init_params(key, latent_dim, hidden_dim, output_dim, dtype=jnp.float32):
    """Deterministic synthetic parameters (Kaiming-uniform-ish, like nn.Linear)."""
    k1, k2, k3, k4 = jax.random.split(key, 4)
    lim1 = 1.0 / (latent_dim ** 0.5)
    lim2 = 1.0 / (hidden_dim ** 0.5)
    w1 = jax.random.uniform(k1, (latent_dim, hidden_dim), dtype, -lim1, lim1)
    b1 = jax.random.uniform(k2, (hidden_dim,), dtype, -lim1, lim1)
    w2 = jax.random.uniform(k3, (hidden_dim, output_dim), dtype, -lim2, lim2)
    b2 = jax.random.uniform(k4, (output_dim,), dtype, -lim2, lim2)
    return w1, b1, w2, b2


if __name__ == "__main__":
    latent_dim, hidden_dim, output_dim = 16, 32, 64
    batch = 10  # deliberately not a multiple of 8 to exercise batch padding

    key = jax.random.PRNGKey(0)
    kz, kp = jax.random.split(key)
    z = jax.random.normal(kz, (batch, latent_dim), jnp.float32)
    w1, b1, w2, b2 = init_params(kp, latent_dim, hidden_dim, output_dim)

    # Pure-JAX reference (highest-precision matmuls).
    h_ref = jnp.maximum(
        jnp.dot(z, w1, precision=jax.lax.Precision.HIGHEST) + b1, 0.0)
    x_ref = jax.nn.sigmoid(
        jnp.dot(h_ref, w2, precision=jax.lax.Precision.HIGHEST) + b2)

    # --- f32 MXU feed: tight(ish) correctness check ---------------------------
    params_f32 = prepare_params(w1, b1, w2, b2, compute_dtype=jnp.float32)
    dec_f32 = jax.jit(functools.partial(fcnn_decoder_padded, out_dim=output_dim))
    out_f32 = jax.block_until_ready(dec_f32(z, *params_f32))
    assert out_f32.shape == (batch, output_dim)
    assert jnp.allclose(out_f32, x_ref, atol=2e-3), "f32 path mismatch"

    # --- default bf16 MXU feed (f32 accumulation + f32 bias/ReLU/sigmoid) -----
    params_bf16 = prepare_params(w1, b1, w2, b2)  # bf16 by default
    dec_bf16 = jax.jit(functools.partial(fcnn_decoder_padded, out_dim=output_dim))
    out_bf16 = jax.block_until_ready(dec_bf16(z, *params_bf16))
    assert out_bf16.shape == (batch, output_dim)
    assert jnp.allclose(out_bf16, x_ref, atol=2e-2), "bf16 path mismatch"

    print("KERNEL_OK")
</pallas_src>

<mosaic_0001>
module attributes {stable_mosaic.version = 11 : i64} {
  func.func @_fcnn_decoder_kernel(%arg0: i32, %arg1: i32, %arg2: memref<16x128xf32, #tpu.memory_space<vmem>>, %arg3: memref<128x128xf32, #tpu.memory_space<vmem>>, %arg4: memref<1x128xf32, #tpu.memory_space<vmem>>, %arg5: memref<128x128xf32, #tpu.memory_space<vmem>>, %arg6: memref<1x128xf32, #tpu.memory_space<vmem>>, %arg7: memref<16x128xf32, #tpu.memory_space<vmem>>, %arg8: memref<16x128xf32, #tpu.memory_space<vmem>>) attributes {dimension_semantics = [#tpu.dimension_semantics<parallel>, #tpu.dimension_semantics<arbitrary>], iteration_bounds = array<i64: 1, 1>, scalar_prefetch = 0 : i64, scratch_operands = 1 : i64, tpu.core_type = #tpu.core_type<tc>, window_params = [{transform_indices = @transform_0, window_bounds = array<i64: 16, 128>}, {transform_indices = @transform_1, window_bounds = array<i64: 128, 128>}, {transform_indices = @transform_2, window_bounds = array<i64: 1, 128>}, {transform_indices = @transform_3, window_bounds = array<i64: 128, 128>}, {pipeline_mode = #tpu.pipeline_mode<synchronous>, transform_indices = @transform_4, window_bounds = array<i64: 1, 128>}, {transform_indices = @transform_5, window_bounds = array<i64: 16, 128>}]} {
    %c0_i32 = arith.constant 0 : i32
    %0 = arith.cmpi eq, %arg1, %c0_i32 : i32
    %1 = arith.extui %0 : i1 to i32
    %c0_i32_0 = arith.constant 0 : i32
    %2 = arith.cmpi ne, %1, %c0_i32_0 : i32
    scf.if %2 {
      %cst_16 = arith.constant 0.000000e+00 : f32
      %19 = vector.broadcast %cst_16 : f32 to vector<16x128xf32>
      %c0_17 = arith.constant 0 : index
      %c0_18 = arith.constant 0 : index
      %20 = vector.load %arg8[%c0_17, %c0_18] : memref<16x128xf32, #tpu.memory_space<vmem>>, vector<16x128xf32>
      tpu.vector_store %arg8[%c0_17, %c0_18], %19 {strides = array<i32>} : memref<16x128xf32, #tpu.memory_space<vmem>>, vector<16x128xf32>,
    } else {
    }
    %c0 = arith.constant 0 : index
    %c0_1 = arith.constant 0 : index
    %3 = vector.load %arg2[%c0, %c0_1] : memref<16x128xf32, #tpu.memory_space<vmem>>, vector<16x128xf32>
    %c0_2 = arith.constant 0 : index
    %c0_3 = arith.constant 0 : index
    %4 = vector.load %arg3[%c0_2, %c0_3] : memref<128x128xf32, #tpu.memory_space<vmem>>, vector<128x128xf32>
    %cst = arith.constant dense<0.000000e+00> : vector<16x128xf32>
    %5 = tpu.matmul %3, %4, %cst {dimension_numbers = #tpu.dot_dimension_numbers<[1], [0], [0], [1], [0, 0, 1, 1], [], []>} : vector<16x128xf32>, vector<128x128xf32>, vector<16x128xf32> -> vector<16x128xf32>
    %c0_4 = arith.constant 0 : index
    %c0_5 = arith.constant 0 : index
    %6 = vector.load %arg4[%c0_4, %c0_5] : memref<1x128xf32, #tpu.memory_space<vmem>>, vector<1x128xf32>
    %7 = vector.broadcast %6 : vector<1x128xf32> to vector<16x128xf32>
    %8 = arith.addf %5, %7 : vector<16x128xf32>
    %cst_6 = arith.constant 0.000000e+00 : f32
    %9 = vector.broadcast %cst_6 : f32 to vector<16x128xf32>
    %10 = arith.maximumf %8, %9 : vector<16x128xf32>
    %c0_7 = arith.constant 0 : index
    %c0_8 = arith.constant 0 : index
    %11 = vector.load %arg8[%c0_7, %c0_8] : memref<16x128xf32, #tpu.memory_space<vmem>>, vector<16x128xf32>
    %c0_9 = arith.constant 0 : index
    %c0_10 = arith.constant 0 : index
    %12 = vector.load %arg5[%c0_9, %c0_10] : memref<128x128xf32, #tpu.memory_space<vmem>>, vector<128x128xf32>
    %cst_11 = arith.constant dense<0.000000e+00> : vector<16x128xf32>
    %13 = tpu.matmul %10, %12, %cst_11 {dimension_numbers = #tpu.dot_dimension_numbers<[1], [0], [0], [1], [0, 0, 1, 1], [], []>} : vector<16x128xf32>, vector<128x128xf32>, vector<16x128xf32> -> vector<16x128xf32>
    %14 = arith.addf %11, %13 : vector<16x128xf32>
    %c0_12 = arith.constant 0 : index
    %c0_13 = arith.constant 0 : index
    %15 = vector.load %arg8[%c0_12, %c0_13] : memref<16x128xf32, #tpu.memory_space<vmem>>, vector<16x128xf32>
    tpu.vector_store %arg8[%c0_12, %c0_13], %14 {strides = array<i32>} : memref<16x128xf32, #tpu.memory_space<vmem>>, vector<16x128xf32>,
    %c0_i32_14 = arith.constant 0 : i32
    %16 = arith.cmpi eq, %arg1, %c0_i32_14 : i32
    %17 = arith.extui %16 : i1 to i32
    %c0_i32_15 = arith.constant 0 : i32
    %18 = arith.cmpi ne, %17, %c0_i32_15 : i32
    scf.if %18 {
      %c0_16 = arith.constant 0 : index
      %c0_17 = arith.constant 0 : index
      %19 = vector.load %arg8[%c0_16, %c0_17] : memref<16x128xf32, #tpu.memory_space<vmem>>, vector<16x128xf32>
      %c0_18 = arith.constant 0 : index
      %c0_19 = arith.constant 0 : index
      %20 = vector.load %arg6[%c0_18, %c0_19] : memref<1x128xf32, #tpu.memory_space<vmem>>, vector<1x128xf32>
      %21 = vector.broadcast %20 : vector<1x128xf32> to vector<16x128xf32>
      %22 = arith.addf %19, %21 : vector<16x128xf32>
      %23 = arith.negf %22 : vector<16x128xf32>
      %24 = math.exp %23 : vector<16x128xf32>
      %cst_20 = arith.constant 1.000000e+00 : f32
      %25 = vector.broadcast %cst_20 : f32 to vector<16x128xf32>
      %26 = arith.addf %25, %24 : vector<16x128xf32>
      %27 = arith.divf %25, %26 : vector<16x128xf32>
      %c0_21 = arith.constant 0 : index
      %c0_22 = arith.constant 0 : index
      %28 = vector.load %arg7[%c0_21, %c0_22] : memref<16x128xf32, #tpu.memory_space<vmem>>, vector<16x128xf32>
      tpu.vector_store %arg7[%c0_21, %c0_22], %27 {strides = array<i32>} : memref<16x128xf32, #tpu.memory_space<vmem>>, vector<16x128xf32>,
    } else {
    }
    return
  }
  func.func @transform_0(%arg0: i32, %arg1: i32) -> (i32, i32) {
    %c0_i32 = arith.constant 0 : i32
    %c0_i32_0 = arith.constant 0 : i32
    return %arg0, %c0_i32 : i32, i32
  }
  func.func @transform_1(%arg0: i32, %arg1: i32) -> (i32, i32) {
    %c0_i32 = arith.constant 0 : i32
    %c0_i32_0 = arith.constant 0 : i32
    return %c0_i32, %arg1 : i32, i32
  }
  func.func @transform_2(%arg0: i32, %arg1: i32) -> (i32, i32) {
    %c0_i32 = arith.constant 0 : i32
    %c0_i32_0 = arith.constant 0 : i32
    return %c0_i32, %arg1 : i32, i32
  }
  func.func @transform_3(%arg0: i32, %arg1: i32) -> (i32, i32) {
    %c0_i32 = arith.constant 0 : i32
    %c0_i32_0 = arith.constant 0 : i32
    return %arg1, %c0_i32 : i32, i32
  }
  func.func @transform_4(%arg0: i32, %arg1: i32) -> (i32, i32) {
    %c0_i32 = arith.constant 0 : i32
    %c0_i32_0 = arith.constant 0 : i32
    %c0_i32_1 = arith.constant 0 : i32
    return %c0_i32, %c0_i32_0 : i32, i32
  }
  func.func @transform_5(%arg0: i32, %arg1: i32) -> (i32, i32) {
    %c0_i32 = arith.constant 0 : i32
    %c0_i32_0 = arith.constant 0 : i32
    return %arg0, %c0_i32 : i32, i32
  }
}

</mosaic_0001>

<bundles_post_ra>
// kernel: fcnn_decoder_padded.1
= control target key start
LH: loop header
LB: loop body
LE: loop exit
PB: predicated region body
PF: predicated region fallthrough
CT: control target
= control target key end

     0   :  { %10 = vsyncpa [#allocation4], 0  ;;  %s554_s0 = inlined_call_operand.vmem [shape: f32[16,128], index: 0, kind: input, shape index: {}]   ;;  %s555_s1 = inlined_call_operand.hbm [shape: f32[128,128], index: 1, kind: input, shape index: {}]   ;;  %s556_s2 = inlined_call_operand.vmem [shape: f32[1,128], index: 2, kind: input, shape index: {}]   ;;  %s557_s3 = inlined_call_operand.hbm [shape: f32[128,128], index: 3, kind: input, shape index: {}]   ;;  %s558_s4 = inlined_call_operand.vmem [shape: f32[1,128], index: 4, kind: input, shape index: {}]   ;;  %s559_s5 = inlined_call_operand.hbm [shape: f32[16,128], index: 5, kind: output, shape index: {}]  }
   0x1   :  { %11 = vsyncpa [#allocation7], 0 }
   0x2   :  { %12 = vsyncpa [#allocation5], 0  ;;  %s489_s18 = smov [#allocation3]  }
   0x3   :  { %s20_s19 = sshll.u32 %s489_s18, 4  ;;  %s21_s19 = int_to_ptr.vmem [resolvable:$true] %s20_s19 }
   0x4   :  { %s431_s20 = scalar_lea.vmem %s21_s19, 2048  ;;  %p436_p1 = scmp.lt.s32.totalorder %s21_s19, %s21_s19 }
   0x5   :  { %p432_p0 = scmp.ne.s32.totalorder %s21_s19, %s431_s20  ;;  %p437_p2 = scmp.lt.s32.totalorder %s431_s20, %s431_s20 }
   0x7   :  { %p438_p3 = por %p437_p2, %p436_p1 }
   0x9   :  { %p439_p4 = pnand %p438_p3, %p432_p0 }
   0xb   :  { %442 = shalt.err (!%p439_p4)
}
   0xc   :  { %s490_s21 = smov 128   ;;  %s491_s22 = smov 8  }
   0xd   :  { %26 = dma.hbm_to_vmem [thread:$0]  %s555_s1, 2048, %s21_s19, [#allocation4], %s490_s21, %s490_s21, %s491_s22  }
   0xe   :  { %s492_s25 = smov [#allocation6]  }
   0xf   :  { %s34_s26 = sshll.u32 %s492_s25, 4  ;;  %s35_s26 = int_to_ptr.vmem [resolvable:$true] %s34_s26 }
  0x10   :  { %s451_s27 = scalar_lea.vmem %s35_s26, 2048  ;;  %p456_p6 = scmp.lt.s32.totalorder %s35_s26, %s35_s26 }
  0x11   :  { %p452_p5 = scmp.ne.s32.totalorder %s35_s26, %s451_s27  ;;  %p457_p7 = scmp.lt.s32.totalorder %s451_s27, %s451_s27 }
  0x13   :  { %p458_p8 = por %p457_p7, %p456_p6 }
  0x15   :  { %p459_p9 = pnand %p458_p8, %p452_p5 }
  0x17   :  { %462 = shalt.err (!%p459_p9)
}
  0x18   :  { %40 = dma.hbm_to_vmem [thread:$0]  %s557_s3, 2048, %s35_s26, [#allocation7], %s490_s21, %s490_s21, %s491_s22  }
  0x19   :  { %483 = dma.done.wait [#allocation4], 2048  }
  0x1a   :  { %484 = vsyncadd [#allocation4], 4294965248 }
  0x1b   :  { %485 = dma.done.wait [#allocation7], 2048  }
  0x1c   :  { %486 = vsyncadd [#allocation7], 4294965248  ;;  %v72_v0 = vld [vmem:[#allocation3 + $0x78] sm:$0xff]  ;;  %v71_v1 = vld [vmem:[#allocation3 + $0x70] sm:$0xff] }
  0x1d   :  { %340 = vmatprep.subr.mxu0 %v72_v0  ;;  %v70_v2 = vld [vmem:[#allocation3 + $0x68] sm:$0xff]  ;;  %v69_v3 = vld [vmem:[#allocation3 + $0x60] sm:$0xff]  ;;  %v68_v5 = vld [vmem:[#allocation3 + $0x58] sm:$0xff] }
  0x1e   :  { %341 = vmatpush3.msra.mxu0 %v72_v0  ;;  %v55_v4 = vld [vmem:[%s554_s0] sm:$0xff]  ;;  %v174_v6 = vld [vmem:[#allocation6 + $0x78] sm:$0xff]  ;;  %v173_v7 = vld [vmem:[#allocation6 + $0x70] sm:$0xff] }
  0x1f   :  { %342 = vmatprep.subr.mxu0 %v71_v1  ;;  %372 = vmatprep.mubr.f32.mxu0 %v55_v4  ;;  %v67_v8 = vld [vmem:[#allocation3 + $0x50] sm:$0xff]  ;;  %v172_v9 = vld [vmem:[#allocation6 + $0x68] sm:$0xff]  ;;  %v171_v11 = vld [vmem:[#allocation6 + $0x60] sm:$0xff] }
  0x20   :  { %343 = vmatpush3.msra.mxu0 %v71_v1  ;;  %375 = vmatprep.subr.mxu1 %v174_v6  ;;  %v66_v10 = vld [vmem:[#allocation3 + $0x48] sm:$0xff]  ;;  %v65_v12 = vld [vmem:[#allocation3 + $0x40] sm:$0xff]  ;;  %v170_v13 = vld [vmem:[#allocation6 + $0x58] sm:$0xff] }
  0x21   :  { %344 = vmatprep.subr.mxu0 %v70_v2  ;;  %376 = vmatpush3.msra.mxu1 %v174_v6  ;;  %v64_v14 = vld [vmem:[#allocation3 + $0x38] sm:$0xff]  ;;  %v169_v15 = vld [vmem:[#allocation6 + $0x50] sm:$0xff]  ;;  %v168_v17 = vld [vmem:[#allocation6 + $0x48] sm:$0xff] }
  0x22   :  { %345 = vmatpush3.msra.mxu0 %v70_v2  ;;  %377 = vmatprep.subr.mxu1 %v173_v7  ;;  %v63_v16 = vld [vmem:[#allocation3 + $0x30] sm:$0xff]  ;;  %v62_v18 = vld [vmem:[#allocation3 + $0x28] sm:$0xff]  ;;  %v167_v19 = vld [vmem:[#allocation6 + $0x40] sm:$0xff] }
  0x23   :  { %346 = vmatprep.subr.mxu0 %v69_v3  ;;  %378 = vmatpush3.msra.mxu1 %v173_v7  ;;  %v61_v20 = vld [vmem:[#allocation3 + $0x20] sm:$0xff]  ;;  %v166_v21 = vld [vmem:[#allocation6 + $0x38] sm:$0xff]  ;;  %v165_v23 = vld [vmem:[#allocation6 + $0x30] sm:$0xff] }
  0x24   :  { %347 = vmatpush3.msra.mxu0 %v69_v3  ;;  %379 = vmatprep.subr.mxu1 %v172_v9  ;;  %v60_v22 = vld [vmem:[#allocation3 + $0x18] sm:$0xff]  ;;  %v59_v24 = vld [vmem:[#allocation3 + $0x10] sm:$0xff]  ;;  %v164_v25 = vld [vmem:[#allocation6 + $0x28] sm:$0xff] }
  0x25   :  { %348 = vmatprep.subr.mxu0 %v68_v5  ;;  %380 = vmatpush3.msra.mxu1 %v172_v9  ;;  %v58_v26 = vld [vmem:[#allocation3 + $0x8] sm:$0xff]  ;;  %v163_v27 = vld [vmem:[#allocation6 + $0x20] sm:$0xff]  ;;  %v162_v30 = vld [vmem:[#allocation6 + $0x18] sm:$0xff] }
  0x26   :  { %349 = vmatpush3.msra.mxu0 %v68_v5  ;;  %381 = vmatprep.subr.mxu1 %v171_v11  ;;  %v57_v28 = vld [vmem:[#allocation3] sm:$0xff]  ;;  %v56_v29 = vld [vmem:[%s554_s0 + $0x8] sm:$0xff]  ;;  %v161_v31 = vld [vmem:[#allocation6 + $0x10] sm:$0xff] }
  0x27   :  { %350 = vmatprep.subr.mxu0 %v67_v8  ;;  %382 = vmatpush3.msra.mxu1 %v171_v11  ;;  %v160_v32 = vld [vmem:[#allocation6 + $0x8] sm:$0xff]  ;;  %v159_v33 = vld [vmem:[#allocation6] sm:$0xff] }
  0x28   :  { %351 = vmatpush3.msra.mxu0 %v67_v8  ;;  %383 = vmatprep.subr.mxu1 %v170_v13  ;;  %v300_v34 = vld [vmem:[%s556_s2] ss:$0 sm:$0xff]  ;;  %s493_s2 = smov [#allocation8]  }
  0x29   :  { %352 = vmatprep.subr.mxu0 %v66_v10  ;;  %384 = vmatpush3.msra.mxu1 %v170_v13  ;;  %v301_v41 = vld [vmem:[%s558_s4] ss:$0 sm:$0xff]  ;;  %s287_s10 = sshll.u32 %s493_s2, 4  ;;  %s288_s10 = int_to_ptr.vmem [resolvable:$true] %s287_s10 }
  0x2a   :  { %353 = vmatpush3.msra.mxu0 %v66_v10  ;;  %385 = vmatprep.subr.mxu1 %v169_v15  ;;  %s463_s4 = scalar_lea.vmem %s288_s10, 256  ;;  %p468_p11 = scmp.lt.s32.totalorder %s288_s10, %s288_s10 }
  0x2b   :  { %354 = vmatprep.subr.mxu0 %v65_v12  ;;  %386 = vmatpush3.msra.mxu1 %v169_v15  ;;  %p464_p10 = scmp.ne.s32.totalorder %s288_s10, %s463_s4  ;;  %p469_p12 = scmp.lt.s32.totalorder %s463_s4, %s463_s4 }
  0x2c   :  { %355 = vmatpush3.msra.mxu0 %v65_v12  ;;  %387 = vmatprep.subr.mxu1 %v168_v17 }
  0x2d   :  { %356 = vmatprep.subr.mxu0 %v64_v14  ;;  %388 = vmatpush3.msra.mxu1 %v168_v17  ;;  %p470_p13 = por %p469_p12, %p468_p11 }
  0x2e   :  { %357 = vmatpush3.msra.mxu0 %v64_v14  ;;  %389 = vmatprep.subr.mxu1 %v167_v19 }
  0x2f   :  { %358 = vmatprep.subr.mxu0 %v63_v16  ;;  %390 = vmatpush3.msra.mxu1 %v167_v19  ;;  %p471_p0 = pnand %p470_p13, %p464_p10 }
  0x30   :  { %359 = vmatpush3.msra.mxu0 %v63_v16  ;;  %391 = vmatprep.subr.mxu1 %v166_v21 }
  0x31   :  { %360 = vmatprep.subr.mxu0 %v62_v18  ;;  %392 = vmatpush3.msra.mxu1 %v166_v21 }
  0x32   :  { %361 = vmatpush3.msra.mxu0 %v62_v18  ;;  %393 = vmatprep.subr.mxu1 %v165_v23 }
  0x33   :  { %362 = vmatprep.subr.mxu0 %v61_v20  ;;  %394 = vmatpush3.msra.mxu1 %v165_v23 }
  0x34   :  { %363 = vmatpush3.msra.mxu0 %v61_v20  ;;  %395 = vmatprep.subr.mxu1 %v164_v25 }
  0x35   :  { %364 = vmatprep.subr.mxu0 %v60_v22  ;;  %396 = vmatpush3.msra.mxu1 %v164_v25 }
  0x36   :  { %365 = vmatpush3.msra.mxu0 %v60_v22  ;;  %397 = vmatprep.subr.mxu1 %v163_v27 }
  0x37   :  { %366 = vmatprep.subr.mxu0 %v59_v24  ;;  %398 = vmatpush3.msra.mxu1 %v163_v27 }
  0x38   :  { %367 = vmatpush3.msra.mxu0 %v59_v24  ;;  %399 = vmatprep.subr.mxu1 %v162_v30 }
  0x39   :  { %368 = vmatprep.subr.mxu0 %v58_v26  ;;  %400 = vmatpush3.msra.mxu1 %v162_v30 }
  0x3a   :  { %369 = vmatpush3.msra.mxu0 %v58_v26  ;;  %401 = vmatprep.subr.mxu1 %v161_v31 }
  0x3b   :  { %370 = vmatprep.subr.mxu0 %v57_v28  ;;  %402 = vmatpush3.msra.mxu1 %v161_v31 }
  0x3c   :  { %371 = vmatpush3.msra.mxu0 %v57_v28  ;;  %403 = vmatprep.subr.mxu1 %v160_v32 }
  0x3d   :  { %373 = vmatmul.mubr.f32.vlgmr.msra.gmra.mxu0 %v56_v29  ;;  %404 = vmatpush3.msra.mxu1 %v160_v32 }
  0x3e   :  { %405 = vmatprep.subr.mxu1 %v159_v33 }
  0x3f   :  { %406 = vmatpush3.msra.mxu1 %v159_v33 }
  0xfd   :  { %v374_v35 = vpop.f32.mrf.mxu0 }
  0xfe   :  { %v152_v36 = vadd.f32 %v374_v35, %v300_v34 }
  0xff   :  { %v146_v37 = vpop.f32.mrf.mxu0 }
 0x100   :  { %v147_v38 = vadd.f32 %v300_v34, %v146_v37  ;;  %v156_v40 = vmax.f32 %v152_v36, 0.0 }
 0x102   :  { %v155_v39 = vmax.f32 %v147_v38, 0.0 }
 0x104   :  { %407 = vmatprep.mubr.f32.mxu1 %v155_v39 }
 0x105   :  { %408 = vmatmul.mubr.f32.vlgmr.msra.gmra.mxu1 %v156_v40 }
 0x1c5   :  { %v409_v42 = vpop.f32.mrf.mxu1 }
 0x1c6   :  { %v267_v43 = vadd.f32 %v409_v42, %v301_v41 }
 0x1c7   :  { %v241_v44 = vpop.f32.mrf.mxu1 }
 0x1c8   :  { %v303_v45 = vmul.f32 -1.442695, %v267_v43  ;;  %v266_v46 = vadd.f32 %v301_v41, %v241_v44 }
 0x1ca   :  { %415 = vpow2.f32 %v303_v45  ;;  %v302_v47 = vmul.f32 -1.442695, %v266_v46 }
 0x1cc   :  { %417 = vpow2.f32 %v302_v47 }
 0x1d7   :  { %v416_v48 = vpop.eup %415 }
 0x1d8   :  { %v275_v49 = vadd.f32 1.0, %v416_v48 }
 0x1d9   :  { %v418_v50 = vpop.eup %417 }
 0x1da   :  { %419 = vrcp.f32 %v275_v49  ;;  %v274_v51 = vadd.f32 1.0, %v418_v50 }
 0x1dc   :  { %421 = vrcp.f32 %v274_v51 }
 0x1e7   :  { %v420_v52 = vpop.eup %419 }
 0x1e8   :  { %281 = vst [vmem:[#allocation8 + $0x8] sm:$0xff] %v420_v52 }
 0x1e9   :  { %v422_v53 = vpop.eup %421 }
 0x1ea   :  { %280 = vst [vmem:[#allocation8] sm:$0xff] %v422_v53 }
 0x1eb   :  { %474 = shalt.err (!%p471_p0)
}
 0x1ec   :  { %293 = dma.vmem_to_hbm [thread:$0]  %s288_s10, 256, %s559_s5, [#allocation5], %s490_s21, %s490_s21, %s491_s22  }
 0x1ed   :  { %487 = dma.done.wait [#allocation5], 256  }
 0x1ee   :  { %488 = vsyncadd [#allocation5], 4294967040 }
 0x1ef   :  { %297 = vsyncpa [#allocation4], 1 }
 0x1f0   :  { %298 = vsyncpa [#allocation7], 1 }
 0x1f1   :  { %299 = vsyncpa [#allocation5], 1 }

</bundles_post_ra>
